<compile_context>
chip_gen: v6e
topology: v6e:2x2x1
jax: 0.10.0
libtpu: 0.0.40
codegen_flags: <defaults>
</compile_context>

<pallas_src>
import functools

import jax
import jax.numpy as jnp
from jax import lax
from jax.experimental import pallas as pl
from jax.experimental.pallas import tpu as pltpu


def _round_up(n, m):
    return -(-n // m) * m


def _for_chunks(total, chunk, body):
    """Run body(start, rows) over [0, total) in sublane chunks.

    Full chunks are unrolled statically when few, otherwise driven by a
    fori_loop (bounded live ranges); the ragged tail is one static call.
    """
    n_full = total // chunk
    rem = total - n_full * chunk
    if n_full > 0:
        if n_full <= 4:
            for i in range(n_full):
                body(i * chunk, chunk)
        else:
            def loop_body(i, carry):
                body(pl.multiple_of(i * chunk, chunk), chunk)
                return carry
            lax.fori_loop(0, n_full, loop_body, 0)
    if rem > 0:
        body(n_full * chunk, rem)


def _series_decomp_kernel(kernel_size, pad, group, chunk,
                          x_ref, seasonal_ref, trend_ref, xpad_ref, *opt):
    """One (TILE_B, L, tile_f) block: trend = moving_avg(x), seasonal = x - trend."""
    psum_ref = opt[0] if opt else None
    tile_b, L, Ft = x_ref.shape
    K, G = kernel_size, group
    inv_k = jnp.float32(1.0 / K)
    out_dtype = trend_ref.dtype
    if G > 1:
        q = K // G
        r = K - q * G
        n_p = L + (q - 1) * G        # partial sums needed by the combine pass

    for b in range(tile_b):          # static, small (<= 16)
        # ---- replicate-padded series in f32 scratch (single conversion) ------
        def fill_body(c0, rows):
            xpad_ref[pl.ds(pad + c0, rows), :] = (
                x_ref[b, pl.ds(c0, rows), :].astype(jnp.float32))
        _for_chunks(L, chunk, fill_body)
        if pad > 0:
            first = x_ref[b, pl.ds(0, 1), :].astype(jnp.float32)
            last = x_ref[b, pl.ds(L - 1, 1), :].astype(jnp.float32)
            xpad_ref[pl.ds(0, pad), :] = jnp.broadcast_to(first, (pad, Ft))
            xpad_ref[pl.ds(pad + L, pad), :] = jnp.broadcast_to(last, (pad, Ft))

        if G > 1:
            # ---- pass 1: width-G partial sums, register-chunked ---------------
            def l1_body(c0, rows):
                acc = xpad_ref[pl.ds(c0, rows), :]
                for j in range(1, G):
                    acc = acc + xpad_ref[pl.ds(c0 + j, rows), :]
                psum_ref[pl.ds(c0, rows), :] = acc
            _for_chunks(n_p, chunk, l1_body)

            # ---- pass 2: stride-G combine + remainder taps + outputs ----------
            def out_body(c0, rows):
                acc = psum_ref[pl.ds(c0, rows), :]
                for m in range(1, q):
                    acc = acc + psum_ref[pl.ds(c0 + m * G, rows), :]
                for j in range(r):
                    acc = acc + xpad_ref[pl.ds(c0 + q * G + j, rows), :]
                trend = acc * inv_k
                xc = xpad_ref[pl.ds(pad + c0, rows), :]
                trend_ref[b, pl.ds(c0, rows), :] = trend.astype(out_dtype)
                seasonal_ref[b, pl.ds(c0, rows), :] = (xc - trend).astype(out_dtype)
            _for_chunks(L, chunk, out_body)
        else:
            # ---- small K: direct K-tap register-chunked accumulation ----------
            def out_body(c0, rows):
                acc = xpad_ref[pl.ds(c0, rows), :]
                for j in range(1, K):
                    acc = acc + xpad_ref[pl.ds(c0 + j, rows), :]
                trend = acc * inv_k
                xc = xpad_ref[pl.ds(pad + c0, rows), :]
                trend_ref[b, pl.ds(c0, rows), :] = trend.astype(out_dtype)
                seasonal_ref[b, pl.ds(c0, rows), :] = (xc - trend).astype(out_dtype)
            _for_chunks(L, chunk, out_body)


def _vmem_budget_bytes():
    cap = 64 * 1024 * 1024
    try:
        cap = int(pltpu.get_tpu_info().vmem_capacity_bytes)
    except Exception:          # interpret mode / API drift: assume v7x floor
        pass
    # ~72% of physical VMEM, 100 MiB ceiling on the 128 MiB parts (v5e/v6e).
    return int(min(max(int(cap * 0.72), 32 * 1024 * 1024), 100 * 1024 * 1024))


_TILE_F_CANDIDATES = (1024, 896, 768, 640, 512, 384, 256, 128)


def _plan(B, L, C, kernel_size, itemsize):
    pad = (kernel_size - 1) // 2
    budget = _vmem_budget_bytes()

    # sqrt-style tap decomposition for large windows (bounded partial sums).
    group = max(2, int(round(kernel_size ** 0.5))) if kernel_size >= 9 else 1
    q = kernel_size // group if group > 1 else 0
    n_p = L + (q - 1) * group if group > 1 else 0

    l_pad = _round_up(L + 2 * pad, 8)
    p_pad = _round_up(n_p, 8) if group > 1 else 0

    def est(tb, tf):
        io = 6 * tb * L * tf * itemsize          # 1 in + 2 out, double-buffered
        scratch = (l_pad + p_pad) * tf * 4
        return io + scratch + (2 << 20)

    if C % 128 == 0:
        tile_f = next(c for c in _TILE_F_CANDIDATES if C % c == 0)
        while tile_f > 128 and est(1, tile_f) > budget:
            smaller = [c for c in _TILE_F_CANDIDATES if c < tile_f and C % c == 0]
            if not smaller:
                break
            tile_f = smaller[0]
    else:
        # Full-feature block (lanes masked if C < 128) — narrow-F fallback.
        # TODO(synk): extremely large ragged C*L could exceed the VMEM budget
        # here; such shapes would need a halo-tiled sequence axis.
        tile_f = C

    tile_b = 1
    for tb in range(min(B, 16), 0, -1):
        if B % tb == 0 and est(tb, tile_f) <= budget:
            tile_b = tb
            break

    n_f = C // tile_f
    if (B // tile_b) * n_f < 2 and B >= 2:
        # keep >= 2 grid steps so both v7x TensorCores get work
        for tb in range(tile_b, 0, -1):
            if B % tb == 0 and B // tb >= 2:
                tile_b = tb
                break

    chunk = max(8, min(32, (8192 // max(tile_f, 1) // 8) * 8))
    vmem_limit = int(min(budget, max(est(tile_b, tile_f), 16 * 1024 * 1024)))

    return dict(pad=pad, group=group, tile_b=tile_b, tile_f=tile_f, chunk=chunk,
                l_pad=l_pad, p_pad=p_pad, vmem_limit=vmem_limit)


def _decomp_pallas(x, kernel_size):
    B, L, C = x.shape
    plan = _plan(B, L, C, kernel_size, jnp.dtype(x.dtype).itemsize)
    tile_b, tile_f = plan["tile_b"], plan["tile_f"]

    kernel = functools.partial(_series_decomp_kernel, kernel_size, plan["pad"],
                               plan["group"], plan["chunk"])

    scratch = [pltpu.VMEM((plan["l_pad"], tile_f), jnp.float32)]
    if plan["group"] > 1:
        scratch.append(pltpu.VMEM((plan["p_pad"], tile_f), jnp.float32))

    block = (tile_b, L, tile_f)
    idx = lambda i, j: (i, 0, j)

    seasonal, trend = pl.pallas_call(
        kernel,
        out_shape=(jax.ShapeDtypeStruct((B, L, C), x.dtype),   # seasonal
                   jax.ShapeDtypeStruct((B, L, C), x.dtype)),  # trend
        grid_spec=pltpu.PrefetchScalarGridSpec(
            num_scalar_prefetch=0,
            grid=(B // tile_b, C // tile_f),
            in_specs=[pl.BlockSpec(block, idx)],
            out_specs=[pl.BlockSpec(block, idx), pl.BlockSpec(block, idx)],
            scratch_shapes=scratch,
        ),
        compiler_params=pltpu.CompilerParams(
            dimension_semantics=("parallel", "parallel"),
            vmem_limit_bytes=plan["vmem_limit"],
        ),
    )(x)
    return seasonal, trend


def series_decomposition(x, kernel_size):
    """x: (B, L, F) float array. Returns (seasonal, trend), both (B, L, F)."""
    assert kernel_size % 2 == 1, "odd kernel_size required for shape-preserving decomposition"
    B, L, F = x.shape
    if F % 128 == 0:
        return _decomp_pallas(x, kernel_size)
    # Lane-dense fallback for narrow feature dims (Autoformer raw series, F=7/21):
    # fold (B, L, F) -> (1, L, B*F): seq stays on sublanes, B*F on lanes, which
    # avoids <128-lane masked stores inside the kernel; unfold the outputs.
    x2 = jnp.transpose(x, (1, 0, 2)).reshape(1, L, B * F)
    seas2, trend2 = _decomp_pallas(x2, kernel_size)
    seasonal = jnp.transpose(seas2.reshape(L, B, F), (1, 0, 2))
    trend = jnp.transpose(trend2.reshape(L, B, F), (1, 0, 2))
    return seasonal, trend


def _reference(x, kernel_size):
    # Pure-JAX reference replicating the PyTorch MovingAvg/decomposition (f32).
    pad = (kernel_size - 1) // 2
    xf = x.astype(jnp.float32)
    front = jnp.repeat(xf[:, 0:1, :], pad, axis=1)
    end = jnp.repeat(xf[:, -1:, :], pad, axis=1)
    x_pad = jnp.concatenate([front, xf, end], axis=1)
    L = x.shape[1]
    trend = sum(x_pad[:, j:j + L, :] for j in range(kernel_size)) / kernel_size
    return xf - trend, trend


if __name__ == "__main__":
    key = jax.random.PRNGKey(0)
    configs = [
        # (B, L, F, kernel_size, dtype)
        (2, 16, 128, 25, jnp.float32),   # lane-aligned, sqrt tap decomposition
        (2, 8, 32, 5, jnp.float32),      # narrow-F folded (lane-dense) path
        (4, 24, 256, 7, jnp.float32),    # batched tiles, single-level taps
        (2, 8, 128, 1, jnp.float32),     # kernel_size == 1 edge case
        (2, 384, 128, 25, jnp.float32),  # long seq: fori-loop chunking path
        (2, 16, 128, 25, jnp.bfloat16),  # bf16 I/O with f32 padded scratch
    ]
    for i, (B, L, F, K, dt) in enumerate(configs):
        k = jax.random.fold_in(key, i)
        x = jax.random.normal(k, (B, L, F), dtype=jnp.float32).astype(dt)

        seasonal, trend = series_decomposition(x, K)
        seasonal, trend = jax.block_until_ready((seasonal, trend))

        seasonal_ref, trend_ref = _reference(x, K)
        tol = 1e-5 if dt == jnp.float32 else 5e-2
        assert jnp.allclose(trend.astype(jnp.float32), trend_ref,
                            atol=tol, rtol=tol), ("trend", B, L, F, K, dt)
        assert jnp.allclose(seasonal.astype(jnp.float32), seasonal_ref,
                            atol=tol, rtol=tol), ("seasonal", B, L, F, K, dt)

    print("KERNEL_OK")
</pallas_src>

<mosaic_0001>
module attributes {stable_mosaic.version = 11 : i64} {
  func.func @_series_decomp_kernel(%arg0: i32, %arg1: i32, %arg2: memref<1x16x128xf32, #tpu.memory_space<vmem>>, %arg3: memref<1x16x128xf32, #tpu.memory_space<vmem>>, %arg4: memref<1x16x128xf32, #tpu.memory_space<vmem>>, %arg5: memref<40x128xf32, #tpu.memory_space<vmem>>, %arg6: memref<40x128xf32, #tpu.memory_space<vmem>>) attributes {dimension_semantics = [#tpu.dimension_semantics<parallel>, #tpu.dimension_semantics<parallel>], iteration_bounds = array<i64: 2, 1>, scalar_prefetch = 0 : i64, scratch_operands = 2 : i64, tpu.core_type = #tpu.core_type<tc>, window_params = [{transform_indices = @transform_0, window_bounds = array<i64: 1, 16, 128>}, {transform_indices = @transform_1, window_bounds = array<i64: 1, 16, 128>}, {transform_indices = @transform_2, window_bounds = array<i64: 1, 16, 128>}]} {
    %c0 = arith.constant 0 : index
    %c0_0 = arith.constant 0 : index
    %c0_1 = arith.constant 0 : index
    %0 = vector.load %arg2[%c0, %c0_0, %c0_1] : memref<1x16x128xf32, #tpu.memory_space<vmem>>, vector<1x16x128xf32>
    %1 = vector.shape_cast %0 : vector<1x16x128xf32> to vector<16x128xf32>
    %c12 = arith.constant 12 : index
    %c0_2 = arith.constant 0 : index
    %2 = vector.load %arg5[%c12, %c0_2] : memref<40x128xf32, #tpu.memory_space<vmem>>, vector<16x128xf32>
    tpu.vector_store %arg5[%c12, %c0_2], %1 {strides = array<i32>} : memref<40x128xf32, #tpu.memory_space<vmem>>, vector<16x128xf32>,
    %c0_3 = arith.constant 0 : index
    %c0_4 = arith.constant 0 : index
    %c0_5 = arith.constant 0 : index
    %3 = vector.load %arg2[%c0_3, %c0_4, %c0_5] : memref<1x16x128xf32, #tpu.memory_space<vmem>>, vector<1x1x128xf32>
    %4 = vector.shape_cast %3 : vector<1x1x128xf32> to vector<1x128xf32>
    %c0_6 = arith.constant 0 : index
    %c15 = arith.constant 15 : index
    %c0_7 = arith.constant 0 : index
    %5 = vector.load %arg2[%c0_6, %c15, %c0_7] : memref<1x16x128xf32, #tpu.memory_space<vmem>>, vector<1x1x128xf32>
    %6 = vector.shape_cast %5 : vector<1x1x128xf32> to vector<1x128xf32>
    %7 = vector.shape_cast %4 : vector<1x128xf32> to vector<1x128xf32>
    %8 = vector.broadcast %7 : vector<1x128xf32> to vector<12x128xf32>
    %c0_8 = arith.constant 0 : index
    %c0_9 = arith.constant 0 : index
    %9 = vector.load %arg5[%c0_8, %c0_9] : memref<40x128xf32, #tpu.memory_space<vmem>>, vector<12x128xf32>
    tpu.vector_store %arg5[%c0_8, %c0_9], %8 {strides = array<i32>} : memref<40x128xf32, #tpu.memory_space<vmem>>, vector<12x128xf32>,
    %10 = vector.shape_cast %6 : vector<1x128xf32> to vector<1x128xf32>
    %11 = vector.broadcast %10 : vector<1x128xf32> to vector<12x128xf32>
    %c28 = arith.constant 28 : index
    %c0_10 = arith.constant 0 : index
    %12 = vector.load %arg5[%c28, %c0_10] : memref<40x128xf32, #tpu.memory_space<vmem>>, vector<12x128xf32>
    tpu.vector_store %arg5[%c28, %c0_10], %11 {strides = array<i32>} : memref<40x128xf32, #tpu.memory_space<vmem>>, vector<12x128xf32>,
    %c0_11 = arith.constant 0 : index
    %c0_12 = arith.constant 0 : index
    %13 = vector.load %arg5[%c0_11, %c0_12] : memref<40x128xf32, #tpu.memory_space<vmem>>, vector<32x128xf32>
    %c1 = arith.constant 1 : index
    %c0_13 = arith.constant 0 : index
    %14 = vector.load %arg5[%c1, %c0_13] : memref<40x128xf32, #tpu.memory_space<vmem>>, vector<32x128xf32>
    %15 = arith.addf %13, %14 : vector<32x128xf32>
    %c2 = arith.constant 2 : index
    %c0_14 = arith.constant 0 : index
    %16 = vector.load %arg5[%c2, %c0_14] : memref<40x128xf32, #tpu.memory_space<vmem>>, vector<32x128xf32>
    %17 = arith.addf %15, %16 : vector<32x128xf32>
    %c3 = arith.constant 3 : index
    %c0_15 = arith.constant 0 : index
    %18 = vector.load %arg5[%c3, %c0_15] : memref<40x128xf32, #tpu.memory_space<vmem>>, vector<32x128xf32>
    %19 = arith.addf %17, %18 : vector<32x128xf32>
    %c4 = arith.constant 4 : index
    %c0_16 = arith.constant 0 : index
    %20 = vector.load %arg5[%c4, %c0_16] : memref<40x128xf32, #tpu.memory_space<vmem>>, vector<32x128xf32>
    %21 = arith.addf %19, %20 : vector<32x128xf32>
    %c0_17 = arith.constant 0 : index
    %c0_18 = arith.constant 0 : index
    %22 = vector.load %arg6[%c0_17, %c0_18] : memref<40x128xf32, #tpu.memory_space<vmem>>, vector<32x128xf32>
    tpu.vector_store %arg6[%c0_17, %c0_18], %21 {strides = array<i32>} : memref<40x128xf32, #tpu.memory_space<vmem>>, vector<32x128xf32>,
    %c32 = arith.constant 32 : index
    %c0_19 = arith.constant 0 : index
    %23 = vector.load %arg5[%c32, %c0_19] : memref<40x128xf32, #tpu.memory_space<vmem>>, vector<4x128xf32>
    %c33 = arith.constant 33 : index
    %c0_20 = arith.constant 0 : index
    %24 = vector.load %arg5[%c33, %c0_20] : memref<40x128xf32, #tpu.memory_space<vmem>>, vector<4x128xf32>
    %25 = arith.addf %23, %24 : vector<4x128xf32>
    %c34 = arith.constant 34 : index
    %c0_21 = arith.constant 0 : index
    %26 = vector.load %arg5[%c34, %c0_21] : memref<40x128xf32, #tpu.memory_space<vmem>>, vector<4x128xf32>
    %27 = arith.addf %25, %26 : vector<4x128xf32>
    %c35 = arith.constant 35 : index
    %c0_22 = arith.constant 0 : index
    %28 = vector.load %arg5[%c35, %c0_22] : memref<40x128xf32, #tpu.memory_space<vmem>>, vector<4x128xf32>
    %29 = arith.addf %27, %28 : vector<4x128xf32>
    %c36 = arith.constant 36 : index
    %c0_23 = arith.constant 0 : index
    %30 = vector.load %arg5[%c36, %c0_23] : memref<40x128xf32, #tpu.memory_space<vmem>>, vector<4x128xf32>
    %31 = arith.addf %29, %30 : vector<4x128xf32>
    %c32_24 = arith.constant 32 : index
    %c0_25 = arith.constant 0 : index
    %32 = vector.load %arg6[%c32_24, %c0_25] : memref<40x128xf32, #tpu.memory_space<vmem>>, vector<4x128xf32>
    tpu.vector_store %arg6[%c32_24, %c0_25], %31 {strides = array<i32>} : memref<40x128xf32, #tpu.memory_space<vmem>>, vector<4x128xf32>,
    %c0_26 = arith.constant 0 : index
    %c0_27 = arith.constant 0 : index
    %33 = vector.load %arg6[%c0_26, %c0_27] : memref<40x128xf32, #tpu.memory_space<vmem>>, vector<16x128xf32>
    %c5 = arith.constant 5 : index
    %c0_28 = arith.constant 0 : index
    %34 = vector.load %arg6[%c5, %c0_28] : memref<40x128xf32, #tpu.memory_space<vmem>>, vector<16x128xf32>
    %35 = arith.addf %33, %34 : vector<16x128xf32>
    %c10 = arith.constant 10 : index
    %c0_29 = arith.constant 0 : index
    %36 = vector.load %arg6[%c10, %c0_29] : memref<40x128xf32, #tpu.memory_space<vmem>>, vector<16x128xf32>
    %37 = arith.addf %35, %36 : vector<16x128xf32>
    %c15_30 = arith.constant 15 : index
    %c0_31 = arith.constant 0 : index
    %38 = vector.load %arg6[%c15_30, %c0_31] : memref<40x128xf32, #tpu.memory_space<vmem>>, vector<16x128xf32>
    %39 = arith.addf %37, %38 : vector<16x128xf32>
    %c20 = arith.constant 20 : index
    %c0_32 = arith.constant 0 : index
    %40 = vector.load %arg6[%c20, %c0_32] : memref<40x128xf32, #tpu.memory_space<vmem>>, vector<16x128xf32>
    %41 = arith.addf %39, %40 : vector<16x128xf32>
    %cst = arith.constant 4.000000e-02 : f32
    %42 = vector.broadcast %cst : f32 to vector<16x128xf32>
    %43 = arith.mulf %41, %42 : vector<16x128xf32>
    %c12_33 = arith.constant 12 : index
    %c0_34 = arith.constant 0 : index
    %44 = vector.load %arg5[%c12_33, %c0_34] : memref<40x128xf32, #tpu.memory_space<vmem>>, vector<16x128xf32>
    %c0_35 = arith.constant 0 : index
    %c0_36 = arith.constant 0 : index
    %c0_37 = arith.constant 0 : index
    %45 = vector.load %arg4[%c0_35, %c0_36, %c0_37] : memref<1x16x128xf32, #tpu.memory_space<vmem>>, vector<1x16x128xf32>
    %46 = vector.shape_cast %45 : vector<1x16x128xf32> to vector<16x128xf32>
    %47 = vector.shape_cast %43 : vector<16x128xf32> to vector<1x16x128xf32>
    tpu.vector_store %arg4[%c0_35, %c0_36, %c0_37], %47 {strides = array<i32>} : memref<1x16x128xf32, #tpu.memory_space<vmem>>, vector<1x16x128xf32>,
    %48 = arith.subf %44, %43 : vector<16x128xf32>
    %c0_38 = arith.constant 0 : index
    %c0_39 = arith.constant 0 : index
    %c0_40 = arith.constant 0 : index
    %49 = vector.load %arg3[%c0_38, %c0_39, %c0_40] : memref<1x16x128xf32, #tpu.memory_space<vmem>>, vector<1x16x128xf32>
    %50 = vector.shape_cast %49 : vector<1x16x128xf32> to vector<16x128xf32>
    %51 = vector.shape_cast %48 : vector<16x128xf32> to vector<1x16x128xf32>
    tpu.vector_store %arg3[%c0_38, %c0_39, %c0_40], %51 {strides = array<i32>} : memref<1x16x128xf32, #tpu.memory_space<vmem>>, vector<1x16x128xf32>,
    return
  }
  func.func @transform_0(%arg0: i32, %arg1: i32) -> (i32, i32, i32) {
    %c0_i32 = arith.constant 0 : i32
    %c0_i32_0 = arith.constant 0 : i32
    return %arg0, %c0_i32, %arg1 : i32, i32, i32
  }
  func.func @transform_1(%arg0: i32, %arg1: i32) -> (i32, i32, i32) {
    %c0_i32 = arith.constant 0 : i32
    %c0_i32_0 = arith.constant 0 : i32
    return %arg0, %c0_i32, %arg1 : i32, i32, i32
  }
  func.func @transform_2(%arg0: i32, %arg1: i32) -> (i32, i32, i32) {
    %c0_i32 = arith.constant 0 : i32
    %c0_i32_0 = arith.constant 0 : i32
    return %arg0, %c0_i32, %arg1 : i32, i32, i32
  }
}

</mosaic_0001>

<bundles_post_ra>
// kernel: tpu_custom_call.1
= control target key start
LH: loop header
LB: loop body
LE: loop exit
PB: predicated region body
PF: predicated region fallthrough
CT: control target
= control target key end

     0   :  { %8 = vsyncpa [#allocation5], 0  ;;  %s901_s0 = inlined_call_operand.hbm [shape: f32[2,16,128], index: 0, kind: input, shape index: {}]   ;;  %s902_s1 = inlined_call_operand.hbm [shape: f32[2,16,128], index: 1, kind: output, shape index: {0}]   ;;  %s903_s2 = inlined_call_operand.hbm [shape: f32[2,16,128], index: 2, kind: output, shape index: {1}]  }
   0x1   :  { %10 = vsyncpa [#allocation5 + $0x1], 0 }
   0x2   :  { %11 = vsyncpa [#allocation6], 0 }
   0x3   :  { %13 = vsyncpa [#allocation6 + $0x1], 0 }
   0x4   :  { %14 = vsyncpa [#allocation9], 0 }
   0x5   :  { %16 = vsyncpa [#allocation9 + $0x1], 0  ;;  %s701_s9 = smov 0   ;;  %s703_s10 = smov 0  }
   0x6   :  { %s705_s11 = smov 0   ;;  %s707_s12 = smov 0  }
   0x7   :  { %s709_s13 = smov 0   ;;  %s711_s14 = smov 0  }
   0x8 LB: > { %s444_s15 = sadd.s32 4294967295, %s677_s14   ;;  %s445_s16 = sadd.s32 4294967294, %s677_s14   ;;  %s677_s14 = sphi %s711_s14, %s22_s14   ;;  %s673_s13 = sphi %s709_s13, %s914_s13   ;;  %s669_s12 = sphi %s707_s12, %s913_s12   ;;  %s665_s11 = sphi %s705_s11, %s912_s11   ;;  %s661_s10 = sphi %s703_s10, %s911_s10   ;;  %s657_s9 = sphi %s701_s9, %s910_s9  }
   0x9   : > { %s34_s17 = sadd.s32 1, %s673_s13  ;;  %s43_s18 = sadd.s32 1, %s665_s11 }
   0xa   : > { %p36_p0 = scmp.ge.s32.totalorder %s34_s17, 2  ;;  %p50_p1 = scmp.ne.s32.totalorder %s665_s11, %s661_s10 }
   0xb   : > { %p51_p2 = scmp.eq.s32.totalorder %s677_s14, 0  ;;  %p56_p3 = scmp.ne.s32.totalorder %s661_s10, %s657_s9 }
   0xc   : > { %s916_s17 = smov (%p36_p0, %s34_s17), 0  ;;  %p57_p5 = scmp.eq.s32.totalorder %s444_s15, 0 }
   0xd   : > { %p742_p4 = por %p51_p2, %p50_p1  ;;  %s38_s20 = ssub.s32 %s673_s13, %s916_s17 }
   0xe   : > { %p82_p6 = scmp.eq.s32.totalorder %s444_s15, 1  ;;  %p41_p7 = scmp.eq.s32.totalorder %s38_s20, 0 }
   0xf   : > { %p748_p8 = por %p57_p5, %p56_p3  ;;  %p88_p10 = scmp.eq.s32.totalorder %s445_s16, 1 }
  0x10   : > { %p752_p9 = por %p82_p6, %p50_p1  ;;  %p485_p13 = scmp.lt.s32.totalorder %s677_s14, 2 }
  0x11   : > { %s757_s23 = scalar_select %p41_p7, %s665_s11, %s43_s18  }
  0x12   : > { %p759_p11 = por %p88_p10, %p56_p3  ;;  %s136_s25 = sand.u32 1, %s665_s11  }
  0x13   : > { %s448_s26 = sshll.u32 %s136_s25, 4  ;;  %s465_s27 = sshll.u32 %s673_s13, 8 }
  0x14   : > { %s147_s30 = scalar_lea.hbm %s901_s0, %s465_s27  ;;  %s140_s3 = scalar_lea.vmem [#allocation4], %s448_s26 }
  0x15   : > { %s148_s4 = sshll.u32 %s140_s3, 4  ;;  %p772_p0 = pnand %p485_p13, %p742_p4  ;;  %s149_s4 = int_to_ptr.vmem [resolvable:$true] %s148_s4 }
  0x16   : > { %p451_p1 = scmp.ge.s32.totalorder %s677_s14, 1  ;;  %s137_s6 = scalar_lea.sflag [#allocation5], %s136_s25 }
  0x17   : > { %p541_p2 = pneg %p772_p0  ;;  %s552_s7 = scalar_lea.vmem %s149_s4, 256 }
  0x18   : > { %p553_p3 = scmp.ne.s32.totalorder %s149_s4, %s552_s7  ;;  %s679_s8 = smov [#allocation4]  }
  0x19   : > { %s557_s15 = sshll.u32 %s679_s8, 4  ;;  %s558_s15 = int_to_ptr.vmem [resolvable:$false] %s557_s15 }
  0x1a   : > { %p555_p5 = pnand %p553_p3, %p541_p2  ;;  %s559_s16 = scalar_lea.vmem %s558_s15, 512 }
  0x1b   : > { %p560_p7 = scmp.lt.s32.totalorder %s149_s4, %s558_s15  ;;  %p561_p10 = scmp.lt.s32.totalorder %s559_s16, %s552_s7 }
  0x1c   : > { %p556_p6 = pneg %p555_p5 }
  0x1d   : > { %p562_p12 = por %p561_p10, %p560_p7 }
  0x1f   : > { %p563_p4 = pnand %p562_p12, %p556_p6 }
  0x21   : > { %566 = shalt.err (!%p563_p4)
}
  0x22   : > { %s680_s18 = smov 128   ;;  %s681_s19 = smov 8  }
  0x23   : > { %477 = dma.hbm_to_vmem [thread:$0]  (!%p772_p0), %s147_s30, 256, %s149_s4, %s137_s6, %s680_s18, %s680_s18, %s681_s19  }
  0x24   : > { %p156_p13 = scmp.lt.s32.totalorder %s677_s14, 3 }
  0x26   : > { %p157_p2 = pnand %p451_p1, %p156_p13 }
  0x27   : > { %s785_s20 = sand.u32 (!%p157_p2), 1, %s661_s10  }
  0x28   : > { %160 = sbr.rel (%p157_p2) target bundleno = 121 (0x79), region = 24  ;;  %s788_s25 = sshll.u32 (!%p157_p2), %s785_s20, 4 }
  0x29   : > { %s163_s26 = scalar_lea.sflag (!%p157_p2), [#allocation5], %s785_s20  ;;  %s166_s27 = scalar_lea.vmem (!%p157_p2), [#allocation4], %s788_s25 }
  0x2d   : > { %644 = dma.done.wait (%p748_p8), %s163_s26, 256  }
  0x2e   : > { %646 = vsyncadd (%p748_p8), %s163_s26, 4294967040  ;;  %v796_v0 = vld [vmem:[%s166_s27] sm:$0xff]  ;;  %v798_v1 = vld [vmem:[%s166_s27 + $0x8] sm:$0xff]  ;;  %s191_s21 = scalar_lea.vmem [#allocation8], %s788_s25  ;;  %s466_s29 = sshll.u32 %s669_s12, 8 }
  0x2f   : > { %v455_v2 = vld [vmem:[%s166_s27] ss:$0 sm:$0xff]  ;;  %194 = vst [vmem:[#allocation2 + $0xc] sm:$0xff] %v796_v0  ;;  %195 = vst [vmem:[#allocation2 + $0x14] sm:$0xff] %v798_v1  ;;  %v456_v3 = vld [vmem:[%s166_s27 + $0xf] ss:$0 sm:$0xff]  ;;  %s816_s12 = scalar_lea.hbm %s903_s2, %s466_s29  ;;  %s825_s8 = scalar_lea.hbm %s902_s1, %s466_s29 }
  0x30   : > { %202 = vst [vmem:[#allocation2] sm:$0xff] %v455_v2  ;;  %203 = vst [vmem:[#allocation2 + $0x8] sm:$0xf] %v455_v2  ;;  %s325_s28 = sshll.u32 %s191_s21, 4  ;;  %s809_s30 = scalar_lea.vmem [#allocation7], %s788_s25  ;;  %s806_s28 = int_to_ptr.vmem [resolvable:$true] %s325_s28 }
  0x31   : > { %208 = vst [vmem:[#allocation2 + $0x1c] sm:$0xff] %v456_v3  ;;  %209 = vst [vmem:[#allocation2 + $0x24] sm:$0xf] %v456_v3  ;;  %s308_s3 = sshll.u32 %s809_s30, 4  ;;  %s294_s15 = scalar_lea.sflag [#allocation9], %s785_s20  ;;  %s818_s3 = int_to_ptr.vmem [resolvable:$true] %s308_s3 }
  0x32   : > { %s567_s16 = scalar_lea.vmem %s806_s28, 256  ;;  %s682_s18 = smov [#allocation8]  }
  0x33   : > { %p568_p8 = scmp.ne.s32.totalorder %s806_s28, %s567_s16  ;;  %s571_s19 = sshll.u32 %s682_s18, 4  ;;  %s572_s19 = int_to_ptr.vmem [resolvable:$false] %s571_s19 }
  0x34   : > { %s573_s25 = scalar_lea.vmem %s572_s19, 512  ;;  %p574_p1 = scmp.lt.s32.totalorder %s806_s28, %s572_s19 }
  0x35   : > { %p569_p12 = pnand %p568_p8, %p752_p9  ;;  %p575_p3 = scmp.lt.s32.totalorder %s573_s25, %s567_s16 }
  0x36   : > { %v212_v10 = vld [vmem:[#allocation2 + $0x10] sm:$0xff] }
  0x37   : > { %v214_v4 = vld [vmem:[#allocation2 + $0x1] sm:$0xff]  ;;  %v215_v7 = vld [vmem:[#allocation2 + $0x9] sm:$0xff]  ;;  %v216_v14 = vld [vmem:[#allocation2 + $0x11] sm:$0xff]  ;;  %p570_p0 = pneg %p569_p12  ;;  %p576_p5 = por %p575_p3, %p574_p1 }
  0x38   : > { %v218_v5 = vadd.f32 %v455_v2, %v214_v4  ;;  %v211_v6 = vld [vmem:[#allocation2 + $0x8] sm:$0xff]  ;;  %v220_v17 = vadd.f32 %v216_v14, %v212_v10  ;;  %v213_v18 = vld [vmem:[#allocation2 + $0x18] sm:$0xff]  ;;  %v250_v23 = vld [vmem:[#allocation2 + $0x20] sm:$0xf] }
  0x39   : > { %v222_v8 = vld [vmem:[#allocation2 + $0x2] sm:$0xff]  ;;  %v219_v9 = vadd.f32 %v215_v7, %v211_v6  ;;  %v223_v13 = vld [vmem:[#allocation2 + $0xa] sm:$0xff]  ;;  %v217_v19 = vld [vmem:[#allocation2 + $0x19] sm:$0xff]  ;;  %p577_p6 = pnand %p576_p5, %p570_p0 }
  0x3a   : > { %v226_v11 = vadd.f32 %v222_v8, %v218_v5  ;;  %v230_v12 = vld [vmem:[#allocation2 + $0x3] sm:$0xff]  ;;  %v231_v16 = vld [vmem:[#allocation2 + $0xb] sm:$0xff]  ;;  %v221_v22 = vadd.f32 %v217_v19, %v213_v18  ;;  %v225_v28 = vld [vmem:[#allocation2 + $0x1a] sm:$0xff] }
  0x3b   : > { %v227_v15 = vadd.f32 %v223_v13, %v219_v9  ;;  %v224_v21 = vld [vmem:[#allocation2 + $0x12] sm:$0xff]  ;;  %v251_v24 = vld [vmem:[#allocation2 + $0x21] sm:$0xf] }
  0x3c   : > { %v234_v20 = vadd.f32 %v230_v12, %v226_v11  ;;  %v238_v25 = vld [vmem:[#allocation2 + $0x4] sm:$0xff]  ;;  %v228_v27 = vadd.f32 %v224_v21, %v220_v17  ;;  %v252_v29 = vadd.f32 %v251_v24, %v250_v23  ;;  %v232_v32 = vld [vmem:[#allocation2 + $0x13] sm:$0xff]  ;;  %v229_v33 = vadd.f32 %v225_v28, %v221_v22  ;;  %v233_v36 = vld [vmem:[#allocation2 + $0x1b] sm:$0xff] }
  0x3d   : > { %v235_v26 = vadd.f32 %v231_v16, %v227_v15  ;;  %v253_v30 = vld [vmem:[#allocation2 + $0x22] sm:$0xf] }
  0x3e   : > { %v242_v31 = vadd.f32 %v238_v25, %v234_v20  ;;  %v236_v35 = vadd.f32 %v232_v32, %v228_v27  ;;  %v254_v37 = vadd.f32 %v253_v30, %v252_v29  ;;  %v237_v38 = vadd.f32 %v233_v36, %v229_v33  ;;  %v255_v39 = vld [vmem:[#allocation2 + $0x23] sm:$0xf] }
  0x3f   : > { %v243_v34 = vadd.f32 %v235_v26, %v796_v0  ;;  %v257_v40 = vld [vmem:[#allocation2 + $0x24] sm:$0xf] }
  0x40   : > { %246 = vst [vmem:[#allocation3] sm:$0xff] %v242_v31  ;;  %v244_v41 = vadd.f32 %v236_v35, %v798_v1  ;;  %v256_v42 = vadd.f32 %v255_v39, %v254_v37  ;;  %v245_v43 = vadd.f32 %v456_v3, %v237_v38 }
  0x41   : > { %247 = vst [vmem:[#allocation3 + $0x8] sm:$0xff] %v243_v34 }
  0x42   : > { %248 = vst [vmem:[#allocation3 + $0x10] sm:$0xff] %v244_v41  ;;  %v258_v44 = vadd.f32 %v257_v40, %v256_v42  ;;  %249 = vst [vmem:[#allocation3 + $0x18] sm:$0xff] %v245_v43 }
  0x44   : > { %259 = vst [vmem:[#allocation3 + $0x20] sm:$0xf] %v258_v44 }
  0x48   : > { %v262_v45 = vld [vmem:[#allocation3 + $0x5] sm:$0xff] }
  0x49   : > { %v264_v46 = vadd.f32 %v262_v45, %v242_v31  ;;  %v266_v47 = vld [vmem:[#allocation3 + $0xa] sm:$0xff]  ;;  %v267_v52 = vld [vmem:[#allocation3 + $0x12] sm:$0xff] }
  0x4a   : > { %v263_v48 = vld [vmem:[#allocation3 + $0xd] sm:$0xff]  ;;  %v271_v56 = vld [vmem:[#allocation3 + $0x17] sm:$0xff] }
  0x4b   : > { %v268_v49 = vadd.f32 %v266_v47, %v264_v46  ;;  %v265_v50 = vadd.f32 %v263_v48, %v243_v34  ;;  %v270_v51 = vld [vmem:[#allocation3 + $0xf] sm:$0xff]  ;;  %v275_v59 = vld [vmem:[#allocation3 + $0x1c] sm:$0xff] }
  0x4c   : > { %v274_v55 = vld [vmem:[#allocation3 + $0x14] sm:$0xff] }
  0x4d   : > { %v272_v53 = vadd.f32 %v270_v51, %v268_v49  ;;  %v269_v54 = vadd.f32 %v267_v52, %v265_v50 }
  0x4f   : > { %v276_v57 = vadd.f32 %v274_v55, %v272_v53  ;;  %v273_v58 = vadd.f32 %v271_v56, %v269_v54 }
  0x51   : > { %v278_v60 = vmul.f32 0.04, %v276_v57  ;;  %v277_v61 = vadd.f32 %v275_v59, %v273_v58 }
  0x53   : > { %282 = vst [vmem:[%s191_s21] sm:$0xff] %v278_v60  ;;  %v279_v62 = vmul.f32 0.04, %v277_v61  ;;  %v284_v63 = vsub.f32 %v796_v0, %v278_v60 }
  0x55   : > { %283 = vst [vmem:[%s191_s21 + $0x8] sm:$0xff] %v279_v62  ;;  %286 = vst [vmem:[%s809_s30] sm:$0xff] %v284_v63  ;;  %v285_v2 = vsub.f32 %v798_v1, %v279_v62 }
  0x56   : > { %580 = shalt.err (!%p577_p6)
}
  0x57   : > { %s581_s26 = scalar_lea.hbm %s816_s12, 256  ;;  %s585_s29 = scalar_lea.hbm %s903_s2, 512 }
  0x58   : > { %p582_p7 = scmp.ne.s32.totalorder %s816_s12, %s581_s26  ;;  %p586_p13 = scmp.lt.s32.totalorder %s816_s12, %s903_s2 }
  0x59   : > { %p587_p2 = scmp.lt.s32.totalorder %s585_s29, %s581_s26 }
  0x5a   : > { %p583_p10 = pnand %p582_p7, %p752_p9 }
  0x5b   : > { %p588_p8 = por %p587_p2, %p586_p13 }
  0x5c   : > { %p584_p4 = pneg %p583_p10 }
  0x5e   : > { %p589_p12 = pnand %p588_p8, %p584_p4 }
  0x60   : > { %592 = shalt.err (!%p589_p12)
}
  0x61   : > { %s683_s6 = smov 128   ;;  %s684_s7 = smov 8   ;;  %287 = vst [vmem:[%s809_s30 + $0x8] sm:$0xff] %v285_v2 }
  0x62   : > { %471 = dma.vmem_to_hbm [thread:$0]  (%p752_p9), %s806_s28, 256, %s816_s12, %s294_s15, %s683_s6, %s683_s6, %s684_s7  }
  0x63   : > { %s289_s16 = scalar_lea.sflag [#allocation6], %s785_s20  ;;  %s593_s18 = scalar_lea.vmem %s818_s3, 256 }
  0x64   : > { %p594_p0 = scmp.ne.s32.totalorder %s818_s3, %s593_s18  ;;  %s685_s19 = smov [#allocation7]  }
  0x65   : > { %s597_s25 = sshll.u32 %s685_s19, 4  ;;  %s598_s25 = int_to_ptr.vmem [resolvable:$false] %s597_s25 }
  0x66   : > { %p595_p1 = pnand %p594_p0, %p752_p9  ;;  %s599_s26 = scalar_lea.vmem %s598_s25, 512 }
  0x67   : > { %p600_p5 = scmp.lt.s32.totalorder %s818_s3, %s598_s25  ;;  %p601_p6 = scmp.lt.s32.totalorder %s599_s26, %s593_s18 }
  0x68   : > { %p596_p3 = pneg %p595_p1 }
  0x69   : > { %p602_p7 = por %p601_p6, %p600_p5 }
  0x6b   : > { %p603_p10 = pnand %p602_p7, %p596_p3 }
  0x6d   : > { %606 = shalt.err (!%p603_p10)
}
  0x6e   : > { %s607_s28 = scalar_lea.hbm %s825_s8, 256  ;;  %s611_s12 = scalar_lea.hbm %s902_s1, 512 }
  0x6f   : > { %p608_p4 = scmp.ne.s32.totalorder %s825_s8, %s607_s28  ;;  %p612_p8 = scmp.lt.s32.totalorder %s825_s8, %s902_s1 }
  0x70   : > { %p613_p12 = scmp.lt.s32.totalorder %s611_s12, %s607_s28 }
  0x71   : > { %p609_p13 = pnand %p608_p4, %p752_p9 }
  0x72   : > { %p614_p0 = por %p613_p12, %p612_p8 }
  0x73   : > { %p610_p2 = pneg %p609_p13 }
  0x75   : > { %p615_p1 = pnand %p614_p0, %p610_p2 }
  0x77   : > { %618 = shalt.err (!%p615_p1)
}
  0x78   : > { %470 = dma.vmem_to_hbm [thread:$0]  (%p752_p9), %s818_s3, 256, %s825_s8, %s289_s16, %s683_s6, %s683_s6, %s684_s7  }
  0x79 PF: > { %s340_s21 = sand.u32 1, %s657_s9   ;;  %p909_p3 = scmp.ge.s32.totalorder %s677_s14, 2 }
  0x7a   : > { %s341_s29 = scalar_lea.sflag [#allocation6], %s340_s21 }
  0x7b   : > { %p479_p5 = pnand %p909_p3, %p759_p11 }
  0x7d   : > { %p480_p6 = pneg %p479_p5 }
  0x7f   : > { %648 = dma.done.wait (%p480_p6), %s341_s29, 256  }
  0x80   : > { %650 = vsyncadd (%p480_p6), %s341_s29, 4294967040  ;;  %s350_s4 = scalar_lea.sflag [#allocation9], %s340_s21 }
  0x81   : > { %652 = dma.done.wait (%p480_p6), %s350_s4, 256  }
  0x82   : > { %654 = vsyncadd (%p480_p6), %s350_s4, 4294967040  ;;  %s22_s14 = sadd.s32 1, %s677_s14   ;;  %s910_s9 = smov %s661_s10 }
  0x83   : > { %p19_p7 = scmp.ge.s32.totalorder %s22_s14, 4   ;;  %s911_s10 = smov %s665_s11 }
  0x84   : > { %s912_s11 = smov %s757_s23  ;;  %s913_s12 = smov %s673_s13 }
  0x85   : > { %s914_s13 = smov %s916_s17  ;;  %21 = sbr.rel (!%p19_p7) target bundleno = 8 (0x8), region = 86 }
  0x8a   :  { %355 = vsyncpa [#allocation5], 1 }
  0x8b   :  { %357 = vsyncpa [#allocation5 + $0x1], 1 }
  0x8c   :  { %358 = vsyncpa [#allocation6], 1 }
  0x8d   :  { %360 = vsyncpa [#allocation6 + $0x1], 1 }
  0x8e   :  { %361 = vsyncpa [#allocation9], 1 }
  0x8f   :  { %363 = vsyncpa [#allocation9 + $0x1], 1 }

</bundles_post_ra>
